<compile_context>
chip_gen: v5e
topology: v5e:2x2
jax: 0.10.0
libtpu: 0.0.40
codegen_flags: <defaults>
</compile_context>

<pallas_src>
import math

import jax
import jax.numpy as jnp
from jax.experimental import pallas as pl
from jax.experimental.pallas import tpu as pltpu

# Small synthetic shapes (lane-dense hidden / FFN dims).
B, S, H, FFN, VOCAB = 2, 16, 128, 256, 64


# ---------------------------------------------------------------------------
# Fused kernel: single transformer layer + masked mean pooling epilogue.
# One grid step == one batch row.
# ---------------------------------------------------------------------------
def encoder_pool_kernel(x_ref, mask_ref, wqkv_ref, wo_ref, w1_ref, w2_ref,
                        vecs_ref, b1_ref, out_ref):
    # x_ref    : (1, S, H)  f32   hidden states for this batch row
    # mask_ref : (1, 1, S)  f32   attention mask for this batch row
    # wqkv_ref : (H, 3H)    bf16  fused Q|K|V projection (1/sqrt(H) folded into Q)
    # wo_ref   : (H, H)     bf16
    # w1_ref   : (H, FFN)   bf16
    # w2_ref   : (FFN, H)   bf16
    # vecs_ref : (5, H)     f32   rows: ln1_g, ln1_b, ln2_g, ln2_b, b2
    # b1_ref   : (1, FFN)   f32
    # out_ref  : (1, 1, H)  f32   pooled sentence embedding
    x = x_ref[0]                                   # (S, H) f32
    mask = mask_ref[0]                             # (1, S) f32
    S_, H_ = x.shape

    # --- fused QKV projection: one (S,H)@(H,3H) MXU matmul -------------------
    qkv = jnp.dot(x.astype(jnp.bfloat16), wqkv_ref[...],
                  preferred_element_type=jnp.float32)          # (S, 3H) f32
    q = qkv[:, :H_]
    k = qkv[:, H_:2 * H_]
    v = qkv[:, 2 * H_:]

    # --- attention scores (scale pre-folded into wq) + additive key-mask bias
    scores = jax.lax.dot_general(
        q.astype(jnp.bfloat16), k.astype(jnp.bfloat16),
        (((1,), (1,)), ((), ())),
        preferred_element_type=jnp.float32)                    # (S, S) f32
    scores = scores + (mask - 1.0) * jnp.float32(1e9)          # broadcast over rows

    # --- softmax (f32); normalization on the EUP via approx reciprocal -------
    scores = scores - jnp.max(scores, axis=-1, keepdims=True)
    p = jnp.exp(scores)
    p = p * pl.reciprocal(jnp.sum(p, axis=-1, keepdims=True), approx=True)

    # --- context + output projection -----------------------------------------
    ctx = jnp.dot(p.astype(jnp.bfloat16), v.astype(jnp.bfloat16),
                  preferred_element_type=jnp.float32)          # (S, H) f32
    attn = jnp.dot(ctx.astype(jnp.bfloat16), wo_ref[...],
                   preferred_element_type=jnp.float32)         # (S, H) f32

    vecs = vecs_ref[...]                                       # (5, H) f32
    ln1_g, ln1_b = vecs[0:1], vecs[1:2]
    ln2_g, ln2_b = vecs[2:3], vecs[3:4]
    b2 = vecs[4:5]

    def layer_norm(z, g, b):
        mu = jnp.mean(z, axis=-1, keepdims=True)
        var = jnp.mean((z - mu) ** 2, axis=-1, keepdims=True)
        return (z - mu) * jax.lax.rsqrt(var + jnp.float32(1e-12)) * g + b

    h1 = layer_norm(x + attn, ln1_g, ln1_b)                    # (S, H) f32

    # --- feed-forward with tanh-approx GELU ----------------------------------
    ff = jnp.dot(h1.astype(jnp.bfloat16), w1_ref[...],
                 preferred_element_type=jnp.float32) + b1_ref[...]   # (S, FFN)
    c = jnp.float32(math.sqrt(2.0 / math.pi))
    ff = 0.5 * ff * (1.0 + jnp.tanh(c * (ff + 0.044715 * ff * ff * ff)))
    ff = jnp.dot(ff.astype(jnp.bfloat16), w2_ref[...],
                 preferred_element_type=jnp.float32) + b2            # (S, H)

    h2 = layer_norm(h1 + ff, ln2_g, ln2_b)                     # (S, H) f32

    # --- fused masked mean pooling epilogue (exact forward() semantics) ------
    # masked sum over the sequence as a (1,S)@(S,H) matmul -> no transpose,
    # no last_hidden_state write-back to HBM.  Kept in f32 for exactness.
    summed = jnp.dot(mask, h2, preferred_element_type=jnp.float32)   # (1, H)
    denom = jnp.maximum(jnp.sum(mask, axis=-1, keepdims=True),
                        jnp.float32(1e-9))                           # (1, 1)
    out_ref[0] = summed / denom


# ---------------------------------------------------------------------------
# Wrapper
# ---------------------------------------------------------------------------
def run_encoder_pool(x, mask, params):
    """x: (B, S, H) f32, mask: (B, S) f32 -> pooled (B, H) f32."""
    b_, s_, h_ = x.shape
    f_ = params['w1'].shape[1]
    mask3 = mask.reshape(b_, 1, s_)

    out = pl.pallas_call(
        encoder_pool_kernel,
        out_shape=jax.ShapeDtypeStruct((b_, 1, h_), jnp.float32),
        grid=(b_,),
        in_specs=[
            pl.BlockSpec((1, s_, h_), lambda b: (b, 0, 0)),    # x (per-batch row)
            pl.BlockSpec((1, 1, s_), lambda b: (b, 0, 0)),     # mask
            pl.BlockSpec((h_, 3 * h_), lambda b: (0, 0)),      # wqkv
            pl.BlockSpec((h_, h_), lambda b: (0, 0)),          # wo
            pl.BlockSpec((h_, f_), lambda b: (0, 0)),          # w1
            pl.BlockSpec((f_, h_), lambda b: (0, 0)),          # w2
            pl.BlockSpec((5, h_), lambda b: (0, 0)),           # packed ln/bias vecs
            pl.BlockSpec((1, f_), lambda b: (0, 0)),           # b1
        ],
        out_specs=pl.BlockSpec((1, 1, h_), lambda b: (b, 0, 0)),
        compiler_params=pltpu.CompilerParams(
            dimension_semantics=("parallel",)),
    )(x, mask3, params['wqkv'], params['wo'], params['w1'], params['w2'],
      params['vecs'], params['b1'])
    return out.reshape(b_, h_)


def init_params(key):
    ks = jax.random.split(key, 8)
    scale = 0.02
    wq = scale * jax.random.normal(ks[2], (H, H), jnp.float32)
    wk = scale * jax.random.normal(ks[3], (H, H), jnp.float32)
    wv = scale * jax.random.normal(ks[4], (H, H), jnp.float32)
    # Fold the 1/sqrt(H) attention scale into the Q columns (zero runtime cost).
    wqkv = jnp.concatenate([wq * jnp.float32(1.0 / math.sqrt(H)), wk, wv], axis=1)
    # Pack LN gains/biases and the second FFN bias into one (5, H) slab.
    vecs = jnp.stack([
        jnp.ones((H,), jnp.float32),    # ln1_g
        jnp.zeros((H,), jnp.float32),   # ln1_b
        jnp.ones((H,), jnp.float32),    # ln2_g
        jnp.zeros((H,), jnp.float32),   # ln2_b
        jnp.zeros((H,), jnp.float32),   # b2
    ], axis=0)
    return {
        'tok_emb': scale * jax.random.normal(ks[0], (VOCAB, H), jnp.float32),
        'pos_emb': scale * jax.random.normal(ks[1], (S, H), jnp.float32),
        'wqkv': wqkv.astype(jnp.bfloat16),
        'wo': (scale * jax.random.normal(ks[5], (H, H), jnp.float32)).astype(jnp.bfloat16),
        'w1': (scale * jax.random.normal(ks[6], (H, FFN), jnp.float32)).astype(jnp.bfloat16),
        'w2': (scale * jax.random.normal(ks[7], (FFN, H), jnp.float32)).astype(jnp.bfloat16),
        'vecs': vecs,
        'b1': jnp.zeros((1, FFN), jnp.float32),
    }


def text_encoder_forward(model_inputs, params):
    """Mirror of TextEncoder.forward(model_inputs)."""
    input_ids = model_inputs['input_ids']                                 # (B, S) int32
    attention_mask = model_inputs['attention_mask'].astype(jnp.float32)   # (B, S)

    # TODO(synk): the pretrained nomic-embed-text-v1.5 weights cannot be loaded;
    # a deterministic synthetic single-layer encoder stands in for text_model.
    x = jnp.take(params['tok_emb'], input_ids, axis=0) + params['pos_emb'][None]

    # Single fused pallas_call: encoder layer + masked mean pooling epilogue.
    return run_encoder_pool(x, attention_mask, params)


if __name__ == "__main__":
    key = jax.random.PRNGKey(0)
    k_ids, k_params = jax.random.split(key)

    input_ids = jax.random.randint(k_ids, (B, S), 0, VOCAB, dtype=jnp.int32)
    # second sequence has 5 padding positions to exercise the mask path
    attention_mask = jnp.array(
        [[1] * S, [1] * (S - 5) + [0] * 5], dtype=jnp.int32)

    params = init_params(k_params)
    out = text_encoder_forward(
        {'input_ids': input_ids, 'attention_mask': attention_mask}, params)
    out = jax.block_until_ready(out)

    assert out.shape == (B, H) and out.dtype == jnp.float32
    assert bool(jnp.all(jnp.isfinite(out)))
    print("KERNEL_OK")
</pallas_src>

<mosaic_0001>
module attributes {stable_mosaic.version = 11 : i64} {
  func.func @encoder_pool_kernel(%arg0: i32, %arg1: memref<1x16x128xf32, #tpu.memory_space<vmem>>, %arg2: memref<1x1x16xf32, #tpu.memory_space<vmem>>, %arg3: memref<128x384xbf16, #tpu.memory_space<vmem>>, %arg4: memref<128x128xbf16, #tpu.memory_space<vmem>>, %arg5: memref<128x256xbf16, #tpu.memory_space<vmem>>, %arg6: memref<256x128xbf16, #tpu.memory_space<vmem>>, %arg7: memref<5x128xf32, #tpu.memory_space<vmem>>, %arg8: memref<1x256xf32, #tpu.memory_space<vmem>>, %arg9: memref<1x1x128xf32, #tpu.memory_space<vmem>>) attributes {dimension_semantics = [#tpu.dimension_semantics<parallel>], iteration_bounds = array<i64: 2>, scalar_prefetch = 0 : i64, scratch_operands = 0 : i64, tpu.core_type = #tpu.core_type<tc>, window_params = [{transform_indices = @transform_0, window_bounds = array<i64: 1, 16, 128>}, {transform_indices = @transform_1, window_bounds = array<i64: 1, 1, 16>}, {pipeline_mode = #tpu.pipeline_mode<synchronous>, transform_indices = @transform_2, window_bounds = array<i64: 128, 384>}, {pipeline_mode = #tpu.pipeline_mode<synchronous>, transform_indices = @transform_3, window_bounds = array<i64: 128, 128>}, {pipeline_mode = #tpu.pipeline_mode<synchronous>, transform_indices = @transform_4, window_bounds = array<i64: 128, 256>}, {pipeline_mode = #tpu.pipeline_mode<synchronous>, transform_indices = @transform_5, window_bounds = array<i64: 256, 128>}, {pipeline_mode = #tpu.pipeline_mode<synchronous>, transform_indices = @transform_6, window_bounds = array<i64: 5, 128>}, {pipeline_mode = #tpu.pipeline_mode<synchronous>, transform_indices = @transform_7, window_bounds = array<i64: 1, 256>}, {transform_indices = @transform_8, window_bounds = array<i64: 1, 1, 128>}]} {
    %c0 = arith.constant 0 : index
    %c0_0 = arith.constant 0 : index
    %c0_1 = arith.constant 0 : index
    %0 = vector.load %arg1[%c0, %c0_0, %c0_1] : memref<1x16x128xf32, #tpu.memory_space<vmem>>, vector<1x16x128xf32>
    %1 = vector.shape_cast %0 : vector<1x16x128xf32> to vector<16x128xf32>
    %c0_2 = arith.constant 0 : index
    %c0_3 = arith.constant 0 : index
    %c0_4 = arith.constant 0 : index
    %2 = vector.load %arg2[%c0_2, %c0_3, %c0_4] : memref<1x1x16xf32, #tpu.memory_space<vmem>>, vector<1x1x16xf32>
    %3 = vector.shape_cast %2 : vector<1x1x16xf32> to vector<1x16xf32>
    %4 = arith.truncf %1 : vector<16x128xf32> to vector<16x128xbf16>
    %c0_5 = arith.constant 0 : index
    %c0_6 = arith.constant 0 : index
    %5 = vector.load %arg3[%c0_5, %c0_6] : memref<128x384xbf16, #tpu.memory_space<vmem>>, vector<128x384xbf16>
    %cst = arith.constant dense<0.000000e+00> : vector<16x384xf32>
    %6 = tpu.matmul %4, %5, %cst {dimension_numbers = #tpu.dot_dimension_numbers<[1], [0], [0], [1], [0, 0, 1, 1], [], []>} : vector<16x128xbf16>, vector<128x384xbf16>, vector<16x384xf32> -> vector<16x384xf32>
    %7 = vector.extract_strided_slice %6 {offsets = [0, 0], sizes = [16, 128], strides = [1, 1]} : vector<16x384xf32> to vector<16x128xf32>
    %8 = vector.extract_strided_slice %6 {offsets = [0, 128], sizes = [16, 128], strides = [1, 1]} : vector<16x384xf32> to vector<16x128xf32>
    %9 = vector.extract_strided_slice %6 {offsets = [0, 256], sizes = [16, 128], strides = [1, 1]} : vector<16x384xf32> to vector<16x128xf32>
    %10 = arith.truncf %7 : vector<16x128xf32> to vector<16x128xbf16>
    %11 = arith.truncf %8 : vector<16x128xf32> to vector<16x128xbf16>
    %cst_7 = arith.constant dense<0.000000e+00> : vector<16x16xf32>
    %12 = tpu.matmul %10, %11, %cst_7 {dimension_numbers = #tpu.dot_dimension_numbers<[1], [1], [0], [0], [0, 0, 1, 0], [], []>} : vector<16x128xbf16>, vector<16x128xbf16>, vector<16x16xf32> -> vector<16x16xf32>
    %cst_8 = arith.constant 1.000000e+00 : f32
    %13 = vector.broadcast %cst_8 : f32 to vector<1x16xf32>
    %14 = arith.subf %3, %13 : vector<1x16xf32>
    %cst_9 = arith.constant 1.000000e+09 : f32
    %15 = vector.broadcast %cst_9 : f32 to vector<1x16xf32>
    %16 = arith.mulf %14, %15 : vector<1x16xf32>
    %17 = vector.broadcast %16 : vector<1x16xf32> to vector<16x16xf32>
    %18 = arith.addf %12, %17 : vector<16x16xf32>
    %cst_10 = arith.constant dense<0xFF800000> : vector<16xf32>
    %19 = vector.multi_reduction <maximumf>, %18, %cst_10 [1] : vector<16x16xf32> to vector<16xf32>
    %20 = vector.shape_cast %19 : vector<16xf32> to vector<16x1xf32>
    %21 = vector.broadcast %20 : vector<16x1xf32> to vector<16x16xf32>
    %22 = arith.subf %18, %21 : vector<16x16xf32>
    %23 = math.exp %22 : vector<16x16xf32>
    %cst_11 = arith.constant dense<0.000000e+00> : vector<16xf32>
    %24 = vector.multi_reduction <add>, %23, %cst_11 [1] : vector<16x16xf32> to vector<16xf32>
    %25 = vector.shape_cast %24 : vector<16xf32> to vector<16x1xf32>
    %26 = tpu.reciprocal %25 {approx = true} : vector<16x1xf32> -> vector<16x1xf32>
    %27 = vector.broadcast %26 : vector<16x1xf32> to vector<16x16xf32>
    %28 = arith.mulf %23, %27 : vector<16x16xf32>
    %29 = arith.truncf %28 : vector<16x16xf32> to vector<16x16xbf16>
    %30 = arith.truncf %9 : vector<16x128xf32> to vector<16x128xbf16>
    %cst_12 = arith.constant dense<0.000000e+00> : vector<16x128xf32>
    %31 = tpu.matmul %29, %30, %cst_12 {dimension_numbers = #tpu.dot_dimension_numbers<[1], [0], [0], [1], [0, 0, 1, 1], [], []>} : vector<16x16xbf16>, vector<16x128xbf16>, vector<16x128xf32> -> vector<16x128xf32>
    %32 = arith.truncf %31 : vector<16x128xf32> to vector<16x128xbf16>
    %c0_13 = arith.constant 0 : index
    %c0_14 = arith.constant 0 : index
    %33 = vector.load %arg4[%c0_13, %c0_14] : memref<128x128xbf16, #tpu.memory_space<vmem>>, vector<128x128xbf16>
    %cst_15 = arith.constant dense<0.000000e+00> : vector<16x128xf32>
    %34 = tpu.matmul %32, %33, %cst_15 {dimension_numbers = #tpu.dot_dimension_numbers<[1], [0], [0], [1], [0, 0, 1, 1], [], []>} : vector<16x128xbf16>, vector<128x128xbf16>, vector<16x128xf32> -> vector<16x128xf32>
    %c0_16 = arith.constant 0 : index
    %c0_17 = arith.constant 0 : index
    %35 = vector.load %arg7[%c0_16, %c0_17] : memref<5x128xf32, #tpu.memory_space<vmem>>, vector<5x128xf32>
    %36 = vector.extract_strided_slice %35 {offsets = [0, 0], sizes = [1, 128], strides = [1, 1]} : vector<5x128xf32> to vector<1x128xf32>
    %37 = vector.extract_strided_slice %35 {offsets = [1, 0], sizes = [1, 128], strides = [1, 1]} : vector<5x128xf32> to vector<1x128xf32>
    %38 = vector.extract_strided_slice %35 {offsets = [2, 0], sizes = [1, 128], strides = [1, 1]} : vector<5x128xf32> to vector<1x128xf32>
    %39 = vector.extract_strided_slice %35 {offsets = [3, 0], sizes = [1, 128], strides = [1, 1]} : vector<5x128xf32> to vector<1x128xf32>
    %40 = vector.extract_strided_slice %35 {offsets = [4, 0], sizes = [1, 128], strides = [1, 1]} : vector<5x128xf32> to vector<1x128xf32>
    %41 = arith.addf %1, %34 : vector<16x128xf32>
    %cst_18 = arith.constant dense<0.000000e+00> : vector<16xf32>
    %42 = vector.multi_reduction <add>, %41, %cst_18 [1] : vector<16x128xf32> to vector<16xf32>
    %43 = vector.shape_cast %42 : vector<16xf32> to vector<16x1xf32>
    %cst_19 = arith.constant 1.280000e+02 : f32
    %44 = vector.broadcast %cst_19 : f32 to vector<16x1xf32>
    %45 = arith.divf %43, %44 : vector<16x1xf32>
    %46 = vector.broadcast %45 : vector<16x1xf32> to vector<16x128xf32>
    %47 = arith.subf %41, %46 : vector<16x128xf32>
    %48 = arith.mulf %47, %47 : vector<16x128xf32>
    %cst_20 = arith.constant dense<0.000000e+00> : vector<16xf32>
    %49 = vector.multi_reduction <add>, %48, %cst_20 [1] : vector<16x128xf32> to vector<16xf32>
    %50 = vector.shape_cast %49 : vector<16xf32> to vector<16x1xf32>
    %cst_21 = arith.constant 1.280000e+02 : f32
    %51 = vector.broadcast %cst_21 : f32 to vector<16x1xf32>
    %52 = arith.divf %50, %51 : vector<16x1xf32>
    %53 = vector.broadcast %45 : vector<16x1xf32> to vector<16x128xf32>
    %54 = arith.subf %41, %53 : vector<16x128xf32>
    %cst_22 = arith.constant 9.99999996E-13 : f32
    %55 = vector.broadcast %cst_22 : f32 to vector<16x1xf32>
    %56 = arith.addf %52, %55 : vector<16x1xf32>
    %57 = math.rsqrt %56 : vector<16x1xf32>
    %58 = vector.broadcast %57 : vector<16x1xf32> to vector<16x128xf32>
    %59 = arith.mulf %54, %58 : vector<16x128xf32>
    %60 = vector.broadcast %36 : vector<1x128xf32> to vector<16x128xf32>
    %61 = arith.mulf %59, %60 : vector<16x128xf32>
    %62 = vector.broadcast %37 : vector<1x128xf32> to vector<16x128xf32>
    %63 = arith.addf %61, %62 : vector<16x128xf32>
    %64 = arith.truncf %63 : vector<16x128xf32> to vector<16x128xbf16>
    %c0_23 = arith.constant 0 : index
    %c0_24 = arith.constant 0 : index
    %65 = vector.load %arg5[%c0_23, %c0_24] : memref<128x256xbf16, #tpu.memory_space<vmem>>, vector<128x256xbf16>
    %cst_25 = arith.constant dense<0.000000e+00> : vector<16x256xf32>
    %66 = tpu.matmul %64, %65, %cst_25 {dimension_numbers = #tpu.dot_dimension_numbers<[1], [0], [0], [1], [0, 0, 1, 1], [], []>} : vector<16x128xbf16>, vector<128x256xbf16>, vector<16x256xf32> -> vector<16x256xf32>
    %c0_26 = arith.constant 0 : index
    %c0_27 = arith.constant 0 : index
    %67 = vector.load %arg8[%c0_26, %c0_27] : memref<1x256xf32, #tpu.memory_space<vmem>>, vector<1x256xf32>
    %68 = vector.broadcast %67 : vector<1x256xf32> to vector<16x256xf32>
    %69 = arith.addf %66, %68 : vector<16x256xf32>
    %cst_28 = arith.constant 5.000000e-01 : f32
    %70 = vector.broadcast %cst_28 : f32 to vector<16x256xf32>
    %71 = arith.mulf %70, %69 : vector<16x256xf32>
    %cst_29 = arith.constant 4.471500e-02 : f32
    %72 = vector.broadcast %cst_29 : f32 to vector<16x256xf32>
    %73 = arith.mulf %72, %69 : vector<16x256xf32>
    %74 = arith.mulf %73, %69 : vector<16x256xf32>
    %75 = arith.mulf %74, %69 : vector<16x256xf32>
    %76 = arith.addf %69, %75 : vector<16x256xf32>
    %cst_30 = arith.constant 0.797884583 : f32
    %77 = vector.broadcast %cst_30 : f32 to vector<16x256xf32>
    %78 = arith.mulf %77, %76 : vector<16x256xf32>
    %79 = math.tanh %78 : vector<16x256xf32>
    %cst_31 = arith.constant 1.000000e+00 : f32
    %80 = vector.broadcast %cst_31 : f32 to vector<16x256xf32>
    %81 = arith.addf %80, %79 : vector<16x256xf32>
    %82 = arith.mulf %71, %81 : vector<16x256xf32>
    %83 = arith.truncf %82 : vector<16x256xf32> to vector<16x256xbf16>
    %c0_32 = arith.constant 0 : index
    %c0_33 = arith.constant 0 : index
    %84 = vector.load %arg6[%c0_32, %c0_33] : memref<256x128xbf16, #tpu.memory_space<vmem>>, vector<256x128xbf16>
    %cst_34 = arith.constant dense<0.000000e+00> : vector<16x128xf32>
    %85 = tpu.matmul %83, %84, %cst_34 {dimension_numbers = #tpu.dot_dimension_numbers<[1], [0], [0], [1], [0, 0, 1, 1], [], []>} : vector<16x256xbf16>, vector<256x128xbf16>, vector<16x128xf32> -> vector<16x128xf32>
    %86 = vector.broadcast %40 : vector<1x128xf32> to vector<16x128xf32>
    %87 = arith.addf %85, %86 : vector<16x128xf32>
    %88 = arith.addf %63, %87 : vector<16x128xf32>
    %cst_35 = arith.constant dense<0.000000e+00> : vector<16xf32>
    %89 = vector.multi_reduction <add>, %88, %cst_35 [1] : vector<16x128xf32> to vector<16xf32>
    %90 = vector.shape_cast %89 : vector<16xf32> to vector<16x1xf32>
    %cst_36 = arith.constant 1.280000e+02 : f32
    %91 = vector.broadcast %cst_36 : f32 to vector<16x1xf32>
    %92 = arith.divf %90, %91 : vector<16x1xf32>
    %93 = vector.broadcast %92 : vector<16x1xf32> to vector<16x128xf32>
    %94 = arith.subf %88, %93 : vector<16x128xf32>
    %95 = arith.mulf %94, %94 : vector<16x128xf32>
    %cst_37 = arith.constant dense<0.000000e+00> : vector<16xf32>
    %96 = vector.multi_reduction <add>, %95, %cst_37 [1] : vector<16x128xf32> to vector<16xf32>
    %97 = vector.shape_cast %96 : vector<16xf32> to vector<16x1xf32>
    %cst_38 = arith.constant 1.280000e+02 : f32
    %98 = vector.broadcast %cst_38 : f32 to vector<16x1xf32>
    %99 = arith.divf %97, %98 : vector<16x1xf32>
    %100 = vector.broadcast %92 : vector<16x1xf32> to vector<16x128xf32>
    %101 = arith.subf %88, %100 : vector<16x128xf32>
    %cst_39 = arith.constant 9.99999996E-13 : f32
    %102 = vector.broadcast %cst_39 : f32 to vector<16x1xf32>
    %103 = arith.addf %99, %102 : vector<16x1xf32>
    %104 = math.rsqrt %103 : vector<16x1xf32>
    %105 = vector.broadcast %104 : vector<16x1xf32> to vector<16x128xf32>
    %106 = arith.mulf %101, %105 : vector<16x128xf32>
    %107 = vector.broadcast %38 : vector<1x128xf32> to vector<16x128xf32>
    %108 = arith.mulf %106, %107 : vector<16x128xf32>
    %109 = vector.broadcast %39 : vector<1x128xf32> to vector<16x128xf32>
    %110 = arith.addf %108, %109 : vector<16x128xf32>
    %cst_40 = arith.constant dense<0.000000e+00> : vector<1x128xf32>
    %111 = tpu.matmul %3, %110, %cst_40 {dimension_numbers = #tpu.dot_dimension_numbers<[1], [0], [0], [1], [0, 0, 1, 1], [], []>} : vector<1x16xf32>, vector<16x128xf32>, vector<1x128xf32> -> vector<1x128xf32>
    %cst_41 = arith.constant dense<0.000000e+00> : vector<1xf32>
    %112 = vector.multi_reduction <add>, %3, %cst_41 [1] : vector<1x16xf32> to vector<1xf32>
    %113 = vector.shape_cast %112 : vector<1xf32> to vector<1x1xf32>
    %cst_42 = arith.constant 9.99999971E-10 : f32
    %114 = vector.broadcast %cst_42 : f32 to vector<1x1xf32>
    %115 = arith.maximumf %113, %114 : vector<1x1xf32>
    %116 = vector.broadcast %115 : vector<1x1xf32> to vector<1x128xf32>
    %117 = arith.divf %111, %116 : vector<1x128xf32>
    %c0_43 = arith.constant 0 : index
    %c0_44 = arith.constant 0 : index
    %c0_45 = arith.constant 0 : index
    %118 = vector.load %arg9[%c0_43, %c0_44, %c0_45] : memref<1x1x128xf32, #tpu.memory_space<vmem>>, vector<1x1x128xf32>
    %119 = vector.shape_cast %118 : vector<1x1x128xf32> to vector<1x128xf32>
    %120 = vector.shape_cast %117 : vector<1x128xf32> to vector<1x1x128xf32>
    tpu.vector_store %arg9[%c0_43, %c0_44, %c0_45], %120 {strides = array<i32>} : memref<1x1x128xf32, #tpu.memory_space<vmem>>, vector<1x1x128xf32>,
    return
  }
  func.func @transform_0(%arg0: i32) -> (i32, i32, i32) {
    %c0_i32 = arith.constant 0 : i32
    %c0_i32_0 = arith.constant 0 : i32
    %c0_i32_1 = arith.constant 0 : i32
    return %arg0, %c0_i32, %c0_i32_0 : i32, i32, i32
  }
  func.func @transform_1(%arg0: i32) -> (i32, i32, i32) {
    %c0_i32 = arith.constant 0 : i32
    %c0_i32_0 = arith.constant 0 : i32
    %c0_i32_1 = arith.constant 0 : i32
    return %arg0, %c0_i32, %c0_i32_0 : i32, i32, i32
  }
  func.func @transform_2(%arg0: i32) -> (i32, i32) {
    %c0_i32 = arith.constant 0 : i32
    %c0_i32_0 = arith.constant 0 : i32
    %c0_i32_1 = arith.constant 0 : i32
    return %c0_i32, %c0_i32_0 : i32, i32
  }
  func.func @transform_3(%arg0: i32) -> (i32, i32) {
    %c0_i32 = arith.constant 0 : i32
    %c0_i32_0 = arith.constant 0 : i32
    %c0_i32_1 = arith.constant 0 : i32
    return %c0_i32, %c0_i32_0 : i32, i32
  }
  func.func @transform_4(%arg0: i32) -> (i32, i32) {
    %c0_i32 = arith.constant 0 : i32
    %c0_i32_0 = arith.constant 0 : i32
    %c0_i32_1 = arith.constant 0 : i32
    return %c0_i32, %c0_i32_0 : i32, i32
  }
  func.func @transform_5(%arg0: i32) -> (i32, i32) {
    %c0_i32 = arith.constant 0 : i32
    %c0_i32_0 = arith.constant 0 : i32
    %c0_i32_1 = arith.constant 0 : i32
    return %c0_i32, %c0_i32_0 : i32, i32
  }
  func.func @transform_6(%arg0: i32) -> (i32, i32) {
    %c0_i32 = arith.constant 0 : i32
    %c0_i32_0 = arith.constant 0 : i32
    %c0_i32_1 = arith.constant 0 : i32
    return %c0_i32, %c0_i32_0 : i32, i32
  }
  func.func @transform_7(%arg0: i32) -> (i32, i32) {
    %c0_i32 = arith.constant 0 : i32
    %c0_i32_0 = arith.constant 0 : i32
    %c0_i32_1 = arith.constant 0 : i32
    return %c0_i32, %c0_i32_0 : i32, i32
  }
  func.func @transform_8(%arg0: i32) -> (i32, i32, i32) {
    %c0_i32 = arith.constant 0 : i32
    %c0_i32_0 = arith.constant 0 : i32
    %c0_i32_1 = arith.constant 0 : i32
    return %arg0, %c0_i32, %c0_i32_0 : i32, i32, i32
  }
}

</mosaic_0001>

<bundles_post_ra>
// kernel: tpu_custom_call.1
= control target key start
LH: loop header
LB: loop body
LE: loop exit
PB: predicated region body
PF: predicated region fallthrough
CT: control target
= control target key end

     0   :  { %s2516_s0 = inlined_call_operand.hbm [shape: f32[2,16,128], index: 0, kind: input, shape index: {}]   ;;  %s2517_s1 = inlined_call_operand.hbm [shape: f32[2,1,16], index: 1, kind: input, shape index: {}]   ;;  %s2518_s2 = inlined_call_operand.hbm [shape: bf16[128,384], index: 2, kind: input, shape index: {}]   ;;  %s2519_s3 = inlined_call_operand.hbm [shape: bf16[128,128], index: 3, kind: input, shape index: {}]   ;;  %s2520_s4 = inlined_call_operand.hbm [shape: bf16[128,256], index: 4, kind: input, shape index: {}]   ;;  %s2521_s5 = inlined_call_operand.hbm [shape: bf16[256,128], index: 5, kind: input, shape index: {}]   ;;  %s2522_s6 = inlined_call_operand.hbm [shape: f32[5,128], index: 6, kind: input, shape index: {}]   ;;  %s2523_s7 = inlined_call_operand.vmem [shape: f32[1,256], index: 7, kind: input, shape index: {}]   ;;  %s2524_s8 = inlined_call_operand.hbm [shape: f32[2,1,128], index: 8, kind: output, shape index: {}]  }
   0x1   :  { %2528 = sst [smem:[#allocation23_spill]] %s2516_s0 }
   0x2   :  { %2529 = sst [smem:[#allocation24_spill]] %s2518_s2 }
   0x3   :  { %2530 = sst [smem:[#allocation25_spill]] %s2519_s3 }
   0x4   :  { %2531 = sst [smem:[#allocation26_spill]] %s2520_s4 }
   0x5   :  { %2532 = sst [smem:[#allocation27_spill]] %s2521_s5 }
   0x6   :  { %2533 = sst [smem:[#allocation28_spill]] %s2522_s6 }
   0x7   :  { %13 = vsyncpa [#allocation3], 0 }
   0x8   :  { %15 = vsyncpa [#allocation3 + $0x1], 0 }
   0x9   :  { %16 = vsyncpa [#allocation6], 0 }
   0xa   :  { %18 = vsyncpa [#allocation6 + $0x1], 0 }
   0xb   :  { %19 = vsyncpa [#allocation9], 0 }
   0xc   :  { %20 = vsyncpa [#allocation12], 0 }
   0xd   :  { %21 = vsyncpa [#allocation4], 0 }
   0xe   :  { %23 = vsyncpa [#allocation4 + $0x1], 0  ;;  %s2240_s27 = smov 0   ;;  %s2242_s28 = smov 0  }
   0xf   :  { %s2244_s29 = smov 0   ;;  %s2246_s30 = smov 0  }
  0x10 LB: > { %2534 = sst [smem:[#allocation21_spill]] %s2177_s29  ;;  %s2264_s12 = sadd.s32 4294967295, %s2181_s30   ;;  %s2181_s30 = sphi %s2246_s30, %s2556_s30   ;;  %s2177_s29 = sphi %s2244_s29, %s2553_s29   ;;  %s2173_s28 = sphi %s2242_s28, %s2555_s28   ;;  %s2169_s27 = sphi %s2240_s27, %s2554_s27  }
  0x11   : > { %s2535_s2 = sld [smem:[#allocation24_spill]]  ;;  %p1409_p0 = scmp.ge.s32.totalorder %s2181_s30, 1 }
  0x12   : > { %p50_p1 = scmp.eq.s32.totalorder %s2264_s12, 0  ;;  %p238_p2 = scmp.lt.s32.totalorder %s2181_s30, 3 }
  0x13   : > { %s2183_s14 = smov [#allocation7]   ;;  %s2537_s3 = sld [smem:[#allocation25_spill]] }
  0x14   : > { %p2269_p3 = pnand %p1409_p0, %p238_p2  ;;  %s251_s15 = sshll.u32 %s2183_s14, 4  ;;  %s252_s15 = int_to_ptr.vmem [resolvable:$true] %s251_s15 }
  0x15   : > { %s2184_s20 = smov [#allocation8]   ;;  %s2185_s22 = smov 192  }
  0x16   : > { %p1778_p4 = pneg %p2269_p3  ;;  %s265_s21 = sshll.u32 %s2184_s20, 4  ;;  %s266_s21 = int_to_ptr.vmem [resolvable:$true] %s265_s21 }
  0x17   : > { %s249_s11 = sshll.u32 %s2535_s2, 4  ;;  %s2186_s23 = smov 12   ;;  %s250_s11 = int_to_ptr.hbm [resolvable:$true] %s249_s11 }
  0x18   : > { %p2281_p6 = pnand %p1778_p4, %p50_p1  ;;  %s2187_s24 = smov 64  }
  0x19   : > { %s263_s18 = sshll.u32 %s2537_s3, 4  ;;  %s2188_s25 = smov 4   ;;  %s264_s18 = int_to_ptr.hbm [resolvable:$true] %s263_s18 }
  0x1a   : > { %1781 = dma.hbm_to_vmem [thread:$0]  (!%p2281_p6), %s250_s11, 3072, %s252_s15, [#allocation6], %s2185_s22, %s2185_s22, %s2186_s23  }
  0x1b   : > { %1784 = dma.hbm_to_vmem [thread:$0]  (!%p2281_p6), %s264_s18, 1024, %s266_s21, [#allocation9], %s2187_s24, %s2187_s24, %s2188_s25  }
  0x1c   : > { %s2539_s5 = sld [smem:[#allocation27_spill]]  ;;  %s2189_s14 = smov [#allocation11]  }
  0x1d   : > { %s293_s16 = sshll.u32 %s2189_s14, 4  ;;  %s2540_s4 = sld [smem:[#allocation26_spill]]  ;;  %s294_s16 = int_to_ptr.vmem [resolvable:$true] %s293_s16 }
  0x1e   : > { %s2190_s15 = smov [#allocation10]   ;;  %s2525_s21 = smov 128  }
  0x1f   : > { %s279_s18 = sshll.u32 %s2190_s15, 4  ;;  %s2526_s22 = smov 8   ;;  %s280_s18 = int_to_ptr.vmem [resolvable:$true] %s279_s18 }
  0x20   : > { %s2541_s6 = sld [smem:[#allocation28_spill]]  ;;  %s2193_s26 = smov [#allocation13]  }
  0x21   : > { %s308_s9 = sshll.u32 %s2193_s26, 4  ;;  %s2309_s14 = sadd.s32 1, %s2181_s30   ;;  %s309_s9 = int_to_ptr.vmem [resolvable:$true] %s308_s9 }
  0x22   : > { %s291_s10 = sshll.u32 %s2539_s5, 4  ;;  %s33_s17 = ssub.s32 %s2181_s30, %s2309_s14  ;;  %s292_s10 = int_to_ptr.hbm [resolvable:$true] %s291_s10 }
  0x23   : > { %s277_s11 = sshll.u32 %s2540_s4, 4  ;;  %p43_p7 = scmp.ne.s32.totalorder %s2177_s29, %s2173_s28  ;;  %s278_s11 = int_to_ptr.hbm [resolvable:$true] %s277_s11 }
  0x24   : > { %1790 = dma.hbm_to_vmem [thread:$0]  (!%p2281_p6), %s292_s10, 2048, %s294_s16, [#allocation12], %s2187_s24, %s2187_s24, %s2188_s25  }
  0x25   : > { %1787 = dma.hbm_to_vmem [thread:$0]  (!%p2281_p6), %s278_s11, 2048, %s280_s18, [#allocation9], %s2525_s21, %s2525_s21, %s2526_s22  }
  0x26   : > { %s306_s25 = sshll.u32 %s2541_s6, 4  ;;  %s1408_s10 = sadd.s32 4294967294, %s2181_s30   ;;  %s307_s25 = int_to_ptr.hbm [resolvable:$true] %s306_s25 }
  0x27   : > { %1793 = dma.hbm_to_vmem [thread:$0]  (!%p2281_p6), %s307_s25, 128, %s309_s9, [#allocation12]  }
  0x28   : > { %s36_s16 = sadd.s32 1, %s2177_s29  ;;  %p34_p8 = scmp.eq.s32.totalorder %s33_s17, 0 }
  0x29   : > { %p44_p9 = scmp.eq.s32.totalorder %s2181_s30, 0  ;;  %p49_p10 = scmp.ne.s32.totalorder %s2173_s28, %s2169_s27 }
  0x2a   : > { %p225_p11 = scmp.eq.s32.totalorder %s2264_s12, 1  ;;  %p231_p2 = scmp.eq.s32.totalorder %s1408_s10, 1 }
  0x2b   : > { %s2321_s20 = scalar_select %p34_p8, %s2177_s29, %s36_s16  }
  0x2c   : > { %p2323_p12 = por %p44_p9, %p43_p7  ;;  %p2329_p13 = por %p50_p1, %p49_p10 }
  0x2d   : > { %2542 = sst [smem:[#allocation22_spill]] %s2321_s20  ;;  %p2333_p0 = por %p225_p11, %p43_p7 }
  0x2e   : > { %p1810_p4 = scmp.lt.s32.totalorder %s2181_s30, 2  ;;  %s2339_s18 = sand.u32 1, %s2177_s29  }
  0x2f   : > { %p2341_p6 = por %p231_p2, %p49_p10  ;;  %s1416_s24 = sshll.u32 %s2339_s18, 4 }
  0x30   : > { %s1687_s25 = sshll.u32 %s2181_s30, 4  ;;  %s2547_s0 = sld [smem:[#allocation23_spill]] }
  0x31   : > { %s326_s21 = scalar_lea.vmem [#allocation2], %s1416_s24  ;;  %p2352_p7 = pnand %p1810_p4, %p2323_p12 }
  0x32   : > { %s334_s22 = sshll.u32 %s326_s21, 4  ;;  %s344_s2 = sand.u32 1, %s2181_s30   ;;  %s335_s22 = int_to_ptr.vmem [resolvable:$true] %s334_s22 }
  0x33   : > { %s350_s5 = scalar_lea.hbm %s2517_s1, %s2181_s30  ;;  %s323_s6 = scalar_lea.sflag [#allocation3], %s2339_s18 }
  0x34   : > { %p2043_p9 = pneg %p2352_p7 }
  0x36   : > { %s331_s16 = scalar_lea.hbm %s2547_s0, %s1687_s25  ;;  %s2046_s24 = scalar_lea.hbm %s2547_s0, 32 }
  0x37   : > { %s332_s17 = sshll.u32 %s331_s16, 4  ;;  %s333_s17 = int_to_ptr.hbm [resolvable:$true] %s332_s17 }
  0x38   : > { %s2039_s26 = sshra.s32 %s333_s17, 4  ;;  %s2040_s26 = int_to_ptr.hbm [resolvable:$true] %s2039_s26 }
  0x39   : > { %s2041_s25 = scalar_lea.hbm %s2040_s26, 16  ;;  %p2047_p12 = scmp.lt.s32.totalorder %s2040_s26, %s2547_s0 }
  0x3a   : > { %p2042_p8 = scmp.ne.s32.totalorder %s2040_s26, %s2041_s25  ;;  %p2048_p2 = scmp.lt.s32.totalorder %s2046_s24, %s2041_s25 }
  0x3c   : > { %p2044_p10 = pnand %p2043_p9, %p2042_p8  ;;  %p2049_p4 = por %p2048_p2, %p2047_p12 }
  0x3e   : > { %p2045_p11 = pneg %p2044_p10 }
  0x40   : > { %p2050_p5 = pnand %p2049_p4, %p2045_p11 }
  0x42   : > { %2053 = shalt.err (!%p2050_p5)
}
  0x43   : > { %s2549_s3 = smov 8   ;;  %s2550_s4 = smov 128  }
  0x44   : > { %1797 = dma.hbm_to_vmem [thread:$0]  (!%p2352_p7), %s333_s17, 256, %s335_s22, %s323_s6, %s2550_s4, %s2550_s4, %s2549_s3  }
  0x45   : > { %s352_s20 = sshll.u32 %s350_s5, 4  ;;  %s347_s29 = scalar_lea.vmem [#allocation5], %s2339_s18  ;;  %s353_s20 = int_to_ptr.hbm [resolvable:$true] %s352_s20 }
  0x46   : > { %s354_s21 = sshll.u32 %s347_s29, 4  ;;  %s345_s11 = scalar_lea.sflag [#allocation6], %s344_s2  ;;  %s355_s21 = int_to_ptr.vmem [resolvable:$true] %s354_s21 }
  0x47   : > { %s2069_s9 = sshra.s32 %s353_s20, 4  ;;  %s2076_s16 = scalar_lea.hbm %s2517_s1, 2  ;;  %s2070_s9 = int_to_ptr.hbm [resolvable:$true] %s2069_s9 }
  0x48   : > { %s2071_s26 = scalar_lea.hbm %s2070_s9, 1  ;;  %p2077_p11 = scmp.lt.s32.totalorder %s2070_s9, %s2517_s1 }
  0x49   : > { %p2072_p8 = scmp.ne.s32.totalorder %s2070_s9, %s2071_s26  ;;  %p2078_p12 = scmp.lt.s32.totalorder %s2076_s16, %s2071_s26 }
  0x4b   : > { %p2074_p5 = pnand %p2072_p8, %p2043_p9  ;;  %p2079_p2 = por %p2078_p12, %p2077_p11 }
  0x4d   : > { %p2075_p10 = pneg %p2074_p5 }
  0x4f   : > { %p2080_p4 = pnand %p2079_p2, %p2075_p10 }
  0x51   : > { %2083 = shalt.err (!%p2080_p4)
}
  0x52   : > { %1800 = dma.hbm_to_vmem [thread:$0]  (!%p2352_p7), %s353_s20, 16, %s355_s21, %s345_s11  }
  0x53   : > { %363 = sbr.rel (%p2269_p3) target bundleno = 1925 (0x785), region = 52  ;;  %s2393_s2 = sand.u32 (!%p2269_p3), 1, %s2173_s28  }
  0x54   : > { %s1420_s5 = sshll.u32 (!%p2269_p3), %s2393_s2, 4  ;;  %s366_s29 = scalar_lea.sflag (!%p2269_p3), [#allocation3], %s2393_s2 }
  0x55   : > { %s2397_s0 = scalar_lea.vmem (!%p2269_p3), [#allocation2], %s1420_s5 }
  0x58   : > { %2144 = dma.done.wait (%p2329_p13), %s366_s29, 256  }
  0x59   : > { %2146 = vsyncadd (%p2329_p13), %s366_s29, 4294967040  ;;  %s375_s13 = sand.u32 1, %s2264_s12   ;;  %s378_s20 = scalar_lea.vmem [#allocation5], %s2393_s2 }
  0x5a   : > { %s376_s22 = scalar_lea.sflag [#allocation6], %s375_s13 }
  0x5b   : > { %2148 = dma.done.wait (%p2329_p13), %s376_s22, 16  }
  0x5c   : > { %2150 = vsyncadd (%p2329_p13), %s376_s22, 4294967280 }
  0x5d   : > { %2152 = dma.done.wait (%p50_p1), [#allocation6], 3072  }
  0x5e   : > { %2154 = vsyncadd (%p50_p1), [#allocation6], 4294964224 }
  0x5f   : > { %2156 = dma.done.wait (%p50_p1), [#allocation9], 3072  }
  0x60   : > { %2158 = vsyncadd (%p50_p1), [#allocation9], 4294964224 }
  0x61   : > { %2160 = dma.done.wait (%p50_p1), [#allocation12], 2176  }
  0x62   : > { %2162 = vsyncadd (%p50_p1), [#allocation12], 4294965120  ;;  %v1512_v0 = vld [vmem:[#allocation7 + $0xa8] sm:$0xf]  ;;  %v1710_v1 = vld [vmem:[#allocation7 + $0xb0] sm:$0xf0]  ;;  %s1272_s3 = scalar_lea.hbm %s2524_s8, %s2264_s12 }
  0x63   : > { %v1709_v2 = vld [vmem:[#allocation7 + $0xac] sm:$0xf]  ;;  %v1513_v3 = vor.u32 %v1710_v1, %v1512_v0  ;;  %v1514_v4 = vld [vmem:[#allocation7 + $0xb4] sm:$0xf0]  ;;  %v1500_v5 = vld [vmem:[#allocation7 + $0x90] sm:$0xf] }
  0x64   : > { %v1707_v6 = vld [vmem:[#allocation7 + $0x98] sm:$0xf0]  ;;  %v1517_v7 = vor.u32 %v1709_v2, %v1514_v4  ;;  %v1706_v8 = vld [vmem:[#allocation7 + $0x94] sm:$0xf]  ;;  %v1502_v9 = vld [vmem:[#allocation7 + $0x9c] sm:$0xf0] }
  0x65   : > { %605 = vmatpush.bf16.msra.mxu0 %v1513_v3  ;;  %v1501_v10 = vor.u32 %v1707_v6, %v1500_v5  ;;  %v1505_v11 = vor.u32 %v1706_v8, %v1502_v9  ;;  %v1488_v12 = vld [vmem:[#allocation7 + $0x78] sm:$0xf]  ;;  %v1704_v13 = vld [vmem:[#allocation7 + $0x80] sm:$0xf0]  ;;  %v1703_v14 = vld [vmem:[#allocation7 + $0x7c] sm:$0xf] }
  0x66   : > { %619 = vmatpush.bf16.msra.mxu1 %v1517_v7  ;;  %v1490_v15 = vld [vmem:[#allocation7 + $0x84] sm:$0xf0]  ;;  %v1489_v16 = vor.u32 %v1704_v13, %v1488_v12  ;;  %v1476_v18 = vld [vmem:[#allocation7 + $0x60] sm:$0xf]  ;;  %v1701_v19 = vld [vmem:[#allocation7 + $0x68] sm:$0xf0] }
  0x67   : > { %v1493_v17 = vor.u32 %v1703_v14, %v1490_v15  ;;  %v1700_v20 = vld [vmem:[#allocation7 + $0x64] sm:$0xf]  ;;  %v1478_v21 = vld [vmem:[#allocation7 + $0x6c] sm:$0xf0]  ;;  %v1477_v22 = vor.u32 %v1701_v19, %v1476_v18  ;;  %v1464_v24 = vld [vmem:[#allocation7 + $0x48] sm:$0xf] }
  0x68   : > { %v1481_v23 = vor.u32 %v1700_v20, %v1478_v21  ;;  %v1698_v25 = vld [vmem:[#allocation7 + $0x50] sm:$0xf0]  ;;  %v1697_v26 = vld [vmem:[#allocation7 + $0x4c] sm:$0xf]  ;;  %v1466_v27 = vld [vmem:[#allocation7 + $0x54] sm:$0xf0] }
  0x69   : > { %606 = vmatpush.bf16.msra.mxu0 %v1501_v10  ;;  %v1465_v28 = vor.u32 %v1698_v25, %v1464_v24  ;;  %v1469_v29 = vor.u32 %v1697_v26, %v1466_v27  ;;  %v1452_v30 = vld [vmem:[#allocation7 + $0x30] sm:$0xf]  ;;  %v1695_v31 = vld [vmem:[#allocation7 + $0x38] sm:$0xf0]  ;;  %v1694_v32 = vld [vmem:[#allocation7 + $0x34] sm:$0xf] }
  0x6a   : > { %620 = vmatpush.bf16.msra.mxu1 %v1505_v11  ;;  %v1454_v33 = vld [vmem:[#allocation7 + $0x3c] sm:$0xf0]  ;;  %v1453_v34 = vor.u32 %v1695_v31, %v1452_v30  ;;  %v1440_v36 = vld [vmem:[#allocation7 + $0x18] sm:$0xf]  ;;  %v1692_v37 = vld [vmem:[#allocation7 + $0x20] sm:$0xf0] }
  0x6b   : > { %v1457_v35 = vor.u32 %v1694_v32, %v1454_v33  ;;  %v1691_v38 = vld [vmem:[#allocation7 + $0x1c] sm:$0xf]  ;;  %v1442_v39 = vld [vmem:[#allocation7 + $0x24] sm:$0xf0]  ;;  %v1441_v40 = vor.u32 %v1692_v37, %v1440_v36  ;;  %v1428_v42 = vld [vmem:[#allocation7] sm:$0xf] }
  0x6c   : > { %v1445_v41 = vor.u32 %v1691_v38, %v1442_v39  ;;  %v1689_v43 = vld [vmem:[#allocation7 + $0x8] sm:$0xf0]  ;;  %v1688_v44 = vld [vmem:[#allocation7 + $0x4] sm:$0xf]  ;;  %v1430_v45 = vld [vmem:[#allocation7 + $0xc] sm:$0xf0] }
  0x6d   : > { %607 = vmatpush.bf16.msra.mxu0 %v1489_v16  ;;  %v1429_v46 = vor.u32 %v1689_v43, %v1428_v42  ;;  %v2422_v47 = vld [vmem:[%s2397_s0] sm:$0xff]  ;;  %v2425_v48 = vld [vmem:[%s2397_s0 + $0x8] sm:$0xff]  ;;  %v1433_v49 = vor.u32 %v1688_v44, %v1430_v45  ;;  %vm668_vm0 = vcmask 130048   ;;  %vm1242_vm8 = vcmask 122880   ;;  %s439_s4 = scalar_lea.vmem [#allocation14], %s2393_s2  ;;  %s1276_s11 = sshll.u32 %s1272_s3, 4  ;;  %s1277_s11 = int_to_ptr.hbm [resolvable:$true] %s1276_s11 }
  0x6e   : > { %621 = vmatpush.bf16.msra.mxu1 %v1493_v17  ;;  %v444_v50 = vpack.c.bf16 %v2425_v48, %v2422_v47  ;;  %v1520_v57 = vld [vmem:[#allocation7 + $0xb0] sm:$0xf]  ;;  %v1711_v58 = vld [vmem:[#allocation7 + $0xb8] sm:$0xf0]  ;;  %v1508_v59 = vld [vmem:[#allocation7 + $0x98] sm:$0xf] }
  0x6f   : > { %v1521_v60 = vor.u32 %v1711_v58, %v1520_v57  ;;  %v1708_v61 = vld [vmem:[#allocation7 + $0xa0] sm:$0xf0]  ;;  %v1496_v63 = vld [vmem:[#allocation7 + $0x80] sm:$0xf]  ;;  %v1705_v0 = vld [vmem:[#allocation7 + $0x88] sm:$0xf0] }
  0x70   : > { %v1509_v62 = vor.u32 %v1708_v61, %v1508_v59  ;;  %v2431_v1 = vld [vmem:[%s378_s20] sm:$0x1]  ;;  %v1497_v2 = vor.u32 %v1705_v0, %v1496_v63  ;;  %v1484_v3 = vld [vmem:[#allocation7 + $0x68] sm:$0xf]  ;;  %v1702_v4 = vld [vmem:[#allocation7 + $0x70] sm:$0xf0] }
  0x71   : > { %608 = vmatpush.bf16.msra.mxu0 %v1477_v22  ;;  %633 = vmatpush.bf16.msra.mxu2 %v1521_v60  ;;  %v1522_v5 = vadd.f32 -1.0, %v2431_v1  ;;  %v1485_v6 = vor.u32 %v1702_v4, %v1484_v3  ;;  %v1472_v7 = vld [vmem:[#allocation7 + $0x50] sm:$0xf]  ;;  %v1699_v8 = vld [vmem:[#allocation7 + $0x58] sm:$0xf0]  ;;  %v1717_v42 = vld [vmem:[#allocation8 + $0x28] sm:$0xff] }
  0x72   : > { %622 = vmatpush.bf16.msra.mxu1 %v1481_v23  ;;  %v1473_v10 = vor.u32 %v1699_v8, %v1472_v7  ;;  %v1460_v11 = vld [vmem:[#allocation7 + $0x38] sm:$0xf]  ;;  %v1696_v12 = vld [vmem:[#allocation7 + $0x40] sm:$0xf0]  ;;  %v1448_v16 = vld [vmem:[#allocation7 + $0x20] sm:$0xf] }
  0x73   : > { %v650_v9 = vmul.f32 1e+09, %v1522_v5  ;;  %v1461_v14 = vor.u32 %v1696_v12, %v1460_v11  ;;  %v1693_v17 = vld [vmem:[#allocation7 + $0x28] sm:$0xf0]  ;;  %v1436_v21 = vld [vmem:[#allocation7 + $0x8] sm:$0xf] }
  0x74   : > { %v1449_v20 = vor.u32 %v1693_v17, %v1448_v16  ;;  %v1690_v22 = vld [vmem:[#allocation7 + $0x10] sm:$0xf0]  ;;  %v1716_v43 = vld [vmem:[#allocation8 + $0x20] sm:$0xff]  ;;  %v1715_v45 = vld [vmem:[#allocation8 + $0x18] sm:$0xff]  ;;  %v2194_v0 = vmov 128.0   ;;  %s1274_s21 = sshll.u32 %s439_s4, 4  ;;  %s1275_s21 = int_to_ptr.vmem [resolvable:$true] %s1274_s21 }
  0x75   : > { %609 = vmatpush.bf16.msra.mxu0 %v1465_v28  ;;  %634 = vmatpush.bf16.msra.mxu2 %v1509_v62  ;;  %v652_v13 = vperm.slane %v650_v9, 0  ;;  %v1437_v23 = vor.u32 %v1690_v22, %v1436_v21  ;;  %v1734_v16 = vld [vmem:[#allocation10 + $0x74] sm:$0xf]  ;;  %v1733_v21 = vld [vmem:[#allocation10 + $0x64] sm:$0xf0]  ;;  %s1264_s9 = scalar_lea.sflag [#allocation4], %s2393_s2 }
  0x76   : > { %623 = vmatpush.bf16.msra.mxu1 %v1469_v29  ;;  %v1732_v22 = vld [vmem:[#allocation10 + $0x64] sm:$0xf]  ;;  %s2113_s26 = sshra.s32 %s1277_s11, 4  ;;  %s2119_s16 = scalar_lea.hbm %s2524_s8, 2  ;;  %s2114_s26 = int_to_ptr.hbm [resolvable:$true] %s2113_s26 }
  0x77   : > { %s2115_s25 = scalar_lea.hbm %s2114_s26, 1  ;;  %p2120_p7 = scmp.lt.s32.totalorder %s2114_s26, %s2524_s8 }
  0x78   : > { %p2116_p1 = scmp.ne.s32.totalorder %s2114_s26, %s2115_s25  ;;  %p2121_p9 = scmp.lt.s32.totalorder %s2119_s16, %s2115_s25 }
  0x79   : > { %610 = vmatpush.bf16.msra.mxu0 %v1453_v34  ;;  %635 = vmatpush.bf16.msra.mxu2 %v1497_v2 }
  0x7a   : > { %624 = vmatpush.bf16.msra.mxu1 %v1457_v35  ;;  %p2117_p3 = pnand %p2116_p1, %p2333_p0  ;;  %p2122_p8 = por %p2121_p9, %p2120_p7 }
  0x7c   : > { %p2118_p13 = pneg %p2117_p3 }
  0x7d   : > { %611 = vmatpush.bf16.msra.mxu0 %v1441_v40  ;;  %636 = vmatpush.bf16.msra.mxu2 %v1485_v6  ;;  %v1719_v40 = vld [vmem:[#allocation8 + $0x38] sm:$0xff] }
  0x7e   : > { %625 = vmatpush.bf16.msra.mxu1 %v1445_v41  ;;  %v1718_v41 = vld [vmem:[#allocation8 + $0x30] sm:$0xff]  ;;  %p2123_p5 = pnand %p2122_p8, %p2118_p13 }
  0x81   : > { %612 = vmatpush.bf16.msra.mxu0 %v1429_v46  ;;  %637 = vmatpush.bf16.msra.mxu2 %v1473_v10 }
  0x82   : > { %626 = vmatpush.bf16.msra.mxu1 %v1433_v49 }
  0x84   : > { %613 = vmatmul.bf16.vlgmr.msra.gmra.mxu0 %v444_v50 }
  0x85   : > { %627 = vmatmul.bf16.vlgmr.msra.gmra.mxu1 %v444_v50  ;;  %638 = vmatpush.bf16.msra.mxu2 %v1461_v14  ;;  %v1614_v14 = vld [vmem:[#allocation10 + $0x70] sm:$0xf] }
  0x89   : > { %639 = vmatpush.bf16.msra.mxu2 %v1449_v20  ;;  %v1606_v20 = vld [vmem:[#allocation10 + $0x60] sm:$0xf] }
  0x8d   : > { %640 = vmatpush.bf16.msra.mxu2 %v1437_v23  ;;  %v1607_v23 = vor.u32 %v1733_v21, %v1606_v20 }
  0x90   : > { %641 = vmatmul.bf16.vlgmr.msra.gmra.mxu2 %v444_v50 }
 0x101   : > { %v614_v52 = vpop.f32.mrf.mxu0 }
 0x102   : > { %v628_v51 = vpop.f32.mrf.mxu1 }
 0x109   : > { %v616_v55 = vpop.f32.mrf.mxu0 }
 0x10a   : > { %v630_v53 = vpop.f32.mrf.mxu1  ;;  %v647_v56 = vpack.c.bf16 %v616_v55, %v614_v52  ;;  %v1713_v55 = vld [vmem:[#allocation8 + $0x8] sm:$0xff] }
 0x10b   : > { %v648_v54 = vpack.c.bf16 %v630_v53, %v628_v51 }
 0x10d   : > { %661 = vmatpush.bf16.xpose.msrb.mxu1 %v648_v54  ;;  %v1714_v54 = vld [vmem:[#allocation8 + $0x10] sm:$0xff] }
 0x113   : > { %v642_v37 = vpop.f32.mrf.mxu2 }
 0x114   : > { %662 = vmatmul.bf16.vlgmr.msrb.gmra.mxu1 %v647_v56  ;;  %v1712_v56 = vld [vmem:[#allocation8] sm:$0xff] }
 0x11b   : > { %v644_v38 = vpop.f32.mrf.mxu2 }
 0x11c   : > { %v692_v39 = vpack.c.bf16 %v644_v38, %v642_v37  ;;  %v1582_v38 = vld [vmem:[#allocation10 + $0x30] sm:$0xf] }
 0x11e   : > { %703 = vmatpush.bf16.msra.mxu3 %v692_v39  ;;  %v1727_v39 = vld [vmem:[#allocation10 + $0x34] sm:$0xf0] }
 0x122   : > { %775 = vmatpush.bf16.msrb.mxu3 %v1719_v40  ;;  %v1726_v40 = vld [vmem:[#allocation10 + $0x34] sm:$0xf] }
 0x126   : > { %776 = vmatpush.bf16.msrb.mxu3 %v1718_v41  ;;  %v1583_v41 = vor.u32 %v1727_v39, %v1582_v38  ;;  %v1739_v38 = vld [vmem:[#allocation11 + $0x18] sm:$0xff] }
 0x127   : > { %v1747_v39 = vld [vmem:[#allocation11 + $0x58] sm:$0xff] }
 0x12a   : > { %777 = vmatpush.bf16.msrb.mxu3 %v1717_v42  ;;  %v1584_v42 = vld [vmem:[#allocation10 + $0x38] sm:$0xf0] }
 0x12e   : > { %778 = vmatpush.bf16.msrb.mxu3 %v1716_v43  ;;  %v1587_v43 = vor.u32 %v1726_v40, %v1584_v42  ;;  %v1738_v40 = vld [vmem:[#allocation11 + $0x10] sm:$0xff]  ;;  %v1737_v42 = vld [vmem:[#allocation11 + $0x8] sm:$0xff] }
 0x132   : > { %779 = vmatpush.bf16.msrb.mxu3 %v1715_v45  ;;  %v1725_v45 = vld [vmem:[#allocation10 + $0x24] sm:$0xf0] }
 0x136   : > { %780 = vmatpush.bf16.msrb.mxu3 %v1714_v54  ;;  %v1722_v54 = vld [vmem:[#allocation10 + $0x14] sm:$0xf] }
 0x13a   : > { %781 = vmatpush.bf16.msrb.mxu3 %v1713_v55 }
 0x13e   : > { %782 = vmatpush.bf16.msrb.mxu3 %v1712_v56  ;;  %v1568_v56 = vld [vmem:[#allocation10 + $0x18] sm:$0xf0] }
 0x191   : > { %v663_v15 = vpop.f32.mrf.mxu1 }
 0x192   : > { %v664_v18 = vadd.f32 %v663_v15, %v652_v13  ;;  %v1735_v15 = vld [vmem:[#allocation10 + $0x74] sm:$0xf0] }
 0x193   : > { %v1615_v17 = vor.u32 %v1735_v15, %v1614_v14 }
 0x194   : > { %v669_v19 = vsel %vm668_vm0, %v664_v18, -inf }
 0x195   : > { %670 = vmax.xlane.f32.xlu0 %v669_v19  ;;  %948 = vmatpush.bf16.msrb.mxu0 %v1615_v17 }
 0x199   : > { %v665_v24 = vpop.f32.mrf.mxu1  ;;  %949 = vmatpush.bf16.msrb.mxu0 %v1607_v23 }
 0x19a   : > { %v666_v25 = vadd.f32 %v665_v24, %v652_v13  ;;  %v1608_v24 = vld [vmem:[#allocation10 + $0x68] sm:$0xf0] }
 0x19c   : > { %v672_v26 = vsel %vm668_vm0, %v666_v25, -inf }
 0x19d   : > { %673 = vmax.xlane.f32.xlu0 %v672_v26  ;;  %v1598_v26 = vld [vmem:[#allocation10 + $0x50] sm:$0xf] }
 0x208   : > { %v671_v27 = vpop.xlane.xlu0 %670 }
 0x209   : > { %v675_v28 = vsub.f32 %v664_v18, %v671_v27  ;;  %v1616_v18 = vld [vmem:[#allocation10 + $0x78] sm:$0xf0]  ;;  %v1731_v27 = vld [vmem:[#allocation10 + $0x54] sm:$0xf0] }
 0x20a   : > { %v1619_v19 = vor.u32 %v1734_v16, %v1616_v18 }
 0x20b   : > { %v677_v29 = vmul.f32 1.442695, %v675_v28  ;;  %v1730_v28 = vld [vmem:[#allocation10 + $0x54] sm:$0xf] }
 0x20c   : > { %962 = vmatpush.bf16.msra.mxu1 %v1619_v19  ;;  %v2455_v19 = vld [vmem:[#allocation13] sm:$0x1f] }
 0x20d   : > { %1861 = vpow2.f32 %v677_v29  ;;  %v1599_v29 = vor.u32 %v1731_v27, %v1598_v26  ;;  %v842_v27 = vperm.slane %v2455_v19, 1 }
 0x20f   : > { %950 = vmatpush.bf16.msrb.mxu0 %v1599_v29 }
 0x210   : > { %v674_v30 = vpop.xlane.xlu0 %673 }
 0x211   : > { %v676_v31 = vsub.f32 %v666_v25, %v674_v30  ;;  %v1611_v25 = vor.u32 %v1732_v22, %v1608_v24  ;;  %v1600_v30 = vld [vmem:[#allocation10 + $0x58] sm:$0xf0]  ;;  %v839_v22 = vperm.slane %v2455_v19, 0 }
 0x213   : > { %v1862_v32 = vpop.eup %1861  ;;  %v679_v33 = vmul.f32 1.442695, %v676_v31  ;;  %963 = vmatpush.bf16.msra.mxu1 %v1611_v25  ;;  %v1603_v31 = vor.u32 %v1730_v28, %v1600_v30 }
 0x214   : > { %v681_v34 = vsel %vm668_vm0, %v1862_v32, 0.0 }
 0x215   : > { %1863 = vpow2.f32 %v679_v33  ;;  %682 = vadd.xlane.f32.xlu1 %v681_v34  ;;  %v1729_v33 = vld [vmem:[#allocation10 + $0x44] sm:$0xf0]  ;;  %v1728_v34 = vld [vmem:[#allocation10 + $0x44] sm:$0xf] }
 0x217   : > { %964 = vmatpush.bf16.msra.mxu1 %v1603_v31 }
 0x21b   : > { %v1864_v35 = vpop.eup %1863 }
 0x21c   : > { %v684_v36 = vsel %vm668_vm0, %v1864_v35, 0.0 }
 0x21d   : > { %685 = vadd.xlane.f32.xlu1 %v684_v36  ;;  %v1592_v36 = vld [vmem:[#allocation10 + $0x48] sm:$0xf0] }
 0x21e   : > { %v1595_v37 = vor.u32 %v1728_v34, %v1592_v36  ;;  %v1750_v34 = vld [vmem:[#allocation11 + $0x70] sm:$0xff]  ;;  %v1740_v36 = vld [vmem:[#allocation11 + $0x20] sm:$0xff] }
 0x220   : > { %965 = vmatpush.bf16.msra.mxu1 %v1595_v37  ;;  %v1748_v37 = vld [vmem:[#allocation11 + $0x60] sm:$0xff] }
 0x224   : > { %966 = vmatpush.bf16.msra.mxu1 %v1587_v43  ;;  %v1745_v43 = vld [vmem:[#allocation11 + $0x48] sm:$0xff] }
 0x288   : > { %v683_v44 = vpop.xlane.xlu1 %682 }
 0x289   : > { %1865 = vrcp.f32 %v683_v44  ;;  %v1574_v44 = vld [vmem:[#allocation10 + $0x20] sm:$0xf] }
 0x28f   : > { %v1866_v49 = vpop.eup %1865 }
 0x290   : > { %v686_v46 = vpop.xlane.xlu1 %685  ;;  %v689_v51 = vmul.f32 %v1866_v49, %v1862_v32  ;;  %v1590_v32 = vld [vmem:[#allocation10 + $0x40] sm:$0xf]  ;;  %v1575_v49 = vor.u32 %v1725_v45, %v1574_v44  ;;  %v862_v44 = vld [vmem:[%s2523_s7] sm:$0x3] }
 0x291   : > { %1867 = vrcp.f32 %v686_v46  ;;  %v1724_v46 = vld [vmem:[#allocation10 + $0x24] sm:$0xf] }
 0x292   : > { %1869 = vrcp.f32 %v2194_v0  ;;  %v1736_v45 = vld [vmem:[#allocation11] sm:$0xff] }
 0x297   : > { %v1868_v50 = vpop.eup %1867 }
 0x298   : > { %v690_v52 = vmul.f32 %v1868_v50, %v1864_v35  ;;  %v1870_v2 = vpop.eup %1869  ;;  %v1591_v35 = vor.u32 %v1729_v33, %v1590_v32  ;;  %v1576_v50 = vld [vmem:[#allocation10 + $0x28] sm:$0xf0]  ;;  %v1751_v32 = vld [vmem:[#allocation11 + $0x78] sm:$0xff]  ;;  %v1742_v33 = vld [vmem:[#allocation11 + $0x30] sm:$0xff] }
 0x299   : > { %v797_v3 = vmul.f32 128.0, %v1870_v2  ;;  %vm801_vm1 = vweird.f32 %v1870_v2 }
 0x29a   : > { %v691_v53 = vpack.c.bf16 %v690_v52, %v689_v51  ;;  %951 = vmatpush.bf16.msrb.mxu0 %v1591_v35  ;;  %v1579_v51 = vor.u32 %v1724_v46, %v1576_v50  ;;  %v1566_v52 = vld [vmem:[#allocation10 + $0x10] sm:$0xf]  ;;  %v1749_v35 = vld [vmem:[#allocation11 + $0x68] sm:$0xff]  ;;  %v1744_v46 = vld [vmem:[#allocation11 + $0x40] sm:$0xff]  ;;  %v865_v50 = vperm.slane %v862_v44, 1 }
 0x29b   : > { %v798_v4 = vsub.f32 1.0, %v797_v3 }
 0x29c   : > { %1523 = vmatmul.msk.bf16.vlgmr.msra.gmra.mxu3 %vm668_vm0, %v691_v53  ;;  %967 = vmatpush.bf16.msra.mxu1 %v1579_v51  ;;  %v1723_v53 = vld [vmem:[#allocation10 + $0x14] sm:$0xf0] }
 0x29d   : > { %v799_v5 = vmul.f32 %v1870_v2, %v798_v4  ;;  %v1567_v55 = vor.u32 %v1723_v53, %v1566_v52  ;;  %1157 = vmatpush.bf16.msra.mxu3 %v1751_v32 }
 0x29e   : > { %952 = vmatpush.bf16.msrb.mxu0 %v1583_v41  ;;  %v1746_v41 = vld [vmem:[#allocation11 + $0x50] sm:$0xff] }
 0x29f   : > { %v800_v6 = vadd.f32 %v1870_v2, %v799_v5 }
 0x2a1   : > { %v2441_v7 = vsel %vm801_vm1, %v1870_v2, %v800_v6  ;;  %1158 = vmatpush.bf16.msra.mxu3 %v1750_v34 }
 0x2a2   : > { %953 = vmatpush.bf16.msrb.mxu0 %v1575_v49  ;;  %v864_v49 = vperm.slane %v862_v44, 0 }
 0x2a5   : > { %1159 = vmatpush.bf16.msra.mxu3 %v1749_v35 }
 0x2a6   : > { %954 = vmatpush.bf16.msrb.mxu0 %v1567_v55 }
 0x2a9   : > { %1160 = vmatpush.bf16.msra.mxu3 %v1748_v37 }
 0x2ad   : > { %1161 = vmatpush.bf16.msra.mxu3 %v1747_v39 }
 0x2b1   : > { %1162 = vmatpush.bf16.msra.mxu3 %v1746_v41 }
 0x2b5   : > { %1163 = vmatpush.bf16.msra.mxu3 %v1745_v43 }
 0x2b9   : > { %1164 = vmatpush.bf16.msra.mxu3 %v1744_v46 }
 0x31f   : > { %v705_v57 = vpop.f32.mrf.mxu3 }
 0x327   : > { %v707_v58 = vpop.f32.mrf.mxu3 }
 0x328   : > { %v710_v59 = vpack.c.bf16 %v707_v58, %v705_v57  ;;  %v1571_v57 = vor.u32 %v1722_v54, %v1568_v56  ;;  %v1558_v58 = vld [vmem:[#allocation10] sm:$0xf] }
 0x32a   : > { %783 = vmatmul.bf16.vlgmr.msrb.gmra.mxu3 %v710_v59  ;;  %v1721_v59 = vld [vmem:[#allocation10 + $0x4] sm:$0xf0]  ;;  %968 = vmatpush.bf16.msra.mxu1 %v1571_v57 }
 0x3ad   : > { %v784_v60 = vpop.f32.mrf.mxu3 }
 0x3ae   : > { %v790_v61 = vadd.f32 %v784_v60, %v2422_v47  ;;  %v1720_v60 = vld [vmem:[#allocation10 + $0x4] sm:$0xf] }
 0x3b0   : > { %792 = vadd.xlane.f32.xlu2 %v790_v61 }
 0x3b5   : > { %v786_v62 = vpop.f32.mrf.mxu3 }
 0x3b6   : > { %v791_v63 = vadd.f32 %v786_v62, %v2425_v48  ;;  %v1559_v62 = vor.u32 %v1721_v59, %v1558_v58 }
 0x3b8   : > { %794 = vadd.xlane.f32.xlu2 %v791_v63  ;;  %955 = vmatpush.bf16.msrb.mxu0 %v1559_v62 }
 0x423   : > { %v793_v8 = vpop.xlane.xlu2 %792 }
 0x424   : > { %v803_v9 = vmul.f32 %v2441_v7, %v793_v8 }
 0x426   : > { %v2444_v10 = vsub.f32 %v790_v61, %v803_v9 }
 0x428   : > { %v807_v47 = vmul.f32 %v2444_v10, %v2444_v10 }
 0x42a   : > { %809 = vadd.xlane.f32.xlu0 %v807_v47 }
 0x42b   : > { %v795_v48 = vpop.xlane.xlu2 %794 }
 0x42c   : > { %v804_v11 = vmul.f32 %v2441_v7, %v795_v48 }
 0x42e   : > { %v2449_v12 = vsub.f32 %v791_v63, %v804_v11  ;;  %v1560_v63 = vld [vmem:[#allocation10 + $0x8] sm:$0xf0] }
 0x42f   : > { %v1563_v2 = vor.u32 %v1720_v60, %v1560_v63 }
 0x430   : > { %v808_v13 = vmul.f32 %v2449_v12, %v2449_v12 }
 0x431   : > { %969 = vmatpush.bf16.msra.mxu1 %v1563_v2 }
 0x432   : > { %811 = vadd.xlane.f32.xlu1 %v808_v13 }
 0x49d   : > { %v810_v61 = vpop.xlane.xlu0 %809 }
 0x49e   : > { %v813_v0 = vmul.f32 %v810_v61, %v2441_v7 }
 0x4a0   : > { %v815_v3 = vadd.f32 1e-12, %v813_v0 }
 0x4a2   : > { %1871 = vrsqrt.f32 %v815_v3  ;;  %vm823_vm3 = vweird.f32 %v815_v3 }
 0x4a5   : > { %v812_v4 = vpop.xlane.xlu1 %811 }
 0x4a6   : > { %v814_v5 = vmul.f32 %v812_v4, %v2441_v7 }
 0x4a8   : > { %v1872_v6 = vpop.eup %1871  ;;  %v816_v8 = vadd.f32 1e-12, %v814_v5 }
 0x4a9   : > { %v818_v9 = vmul.f32 %v1872_v6, %v815_v3  ;;  %vm824_vm2 = vweird.f32 %v1872_v6 }
 0x4aa   : > { %1873 = vrsqrt.f32 %v816_v8  ;;  %vm825_vm4 = vmor %vm823_vm3, %vm824_vm2  ;;  %vm833_vm6 = vweird.f32 %v816_v8 }
 0x4ab   : > { %v819_v47 = vmul.f32 %v1872_v6, %v818_v9 }
 0x4ad   : > { %v820_v48 = vmul.f32 0.5, %v819_v47 }
 0x4af   : > { %v821_v11 = vsub.f32 1.5, %v820_v48 }
 0x4b0   : > { %v1874_v13 = vpop.eup %1873 }
 0x4b1   : > { %v822_v14 = vmul.f32 %v1872_v6, %v821_v11  ;;  %v828_v15 = vmul.f32 %v1874_v13, %v816_v8  ;;  %vm834_vm5 = vweird.f32 %v1874_v13 }
 0x4b2   : > { %vm835_vm7 = vmor %vm833_vm6, %vm834_vm5 }
 0x4b3   : > { %v829_v16 = vmul.f32 %v1874_v13, %v828_v15  ;;  %v826_v17 = vsel %vm825_vm4, %v1872_v6, %v822_v14 }
 0x4b4   : > { %v837_v21 = vmul.f32 %v826_v17, %v2444_v10  ;;  %v1743_v10 = vld [vmem:[#allocation11 + $0x38] sm:$0xff] }
 0x4b5   : > { %v830_v18 = vmul.f32 0.5, %v829_v16  ;;  %1143 = vmatpush.bf16.msrb.mxu2 %v1743_v10 }
 0x4b6   : > { %v840_v26 = vmul.f32 %v839_v22, %v837_v21 }
 0x4b7   : > { %v831_v20 = vsub.f32 1.5, %v830_v18 }
 0x4b8   : > { %v2461_v29 = vadd.f32 %v842_v27, %v840_v26 }
 0x4b9   : > { %v832_v23 = vmul.f32 %v1874_v13, %v831_v20  ;;  %1144 = vmatpush.bf16.msrb.mxu2 %v1742_v33 }
 0x4bb   : > { %v836_v24 = vsel %vm835_vm7, %v1874_v13, %v832_v23 }
 0x4bc   : > { %v838_v25 = vmul.f32 %v836_v24, %v2449_v12  ;;  %v1741_v12 = vld [vmem:[#allocation11 + $0x28] sm:$0xff] }
 0x4bd   : > { %1145 = vmatpush.bf16.msrb.mxu2 %v1741_v12 }
 0x4be   : > { %v841_v28 = vmul.f32 %v839_v22, %v838_v25 }
 0x4c0   : > { %v2463_v30 = vadd.f32 %v842_v27, %v841_v28 }
 0x4c1   : > { %1146 = vmatpush.bf16.msrb.mxu2 %v1740_v36  ;;  %v1046_v36 = vperm.slane %v2455_v19, 4 }
 0x4c2   : > { %v845_v31 = vpack.c.bf16 %v2463_v30, %v2461_v29 }
 0x4c4   : > { %956 = vmatmul.bf16.vlgmr.msrb.gmra.mxu0 %v845_v31  ;;  %970 = vmatmul.bf16.vlgmr.msra.gmra.mxu1 %v845_v31 }
 0x4c5   : > { %1147 = vmatpush.bf16.msrb.mxu2 %v1739_v38 }
 0x4c9   : > { %1148 = vmatpush.bf16.msrb.mxu2 %v1738_v40 }
 0x4cd   : > { %1149 = vmatpush.bf16.msrb.mxu2 %v1737_v42 }
 0x4d1   : > { %1150 = vmatpush.bf16.msrb.mxu2 %v1736_v45 }
 0x541   : > { %v957_v51 = vpop.f32.mrf.mxu0  ;;  %v971_v52 = vpop.f32.mrf.mxu1 }
 0x542   : > { %v958_v53 = vadd.f32 %v957_v51, %v864_v49  ;;  %v972_v54 = vadd.f32 %v971_v52, %v865_v50 }
 0x544   : > { %v980_v55 = vmul.f32 0.044715, %v958_v53  ;;  %v981_v56 = vmul.f32 0.044715, %v972_v54  ;;  %v976_v24 = vmul.f32 0.5, %v958_v53  ;;  %v977_v27 = vmul.f32 0.5, %v972_v54 }
 0x546   : > { %v984_v57 = vmul.f32 %v980_v55, %v958_v53  ;;  %v985_v58 = vmul.f32 %v981_v56, %v972_v54 }
 0x548   : > { %v989_v59 = vmul.f32 %v985_v58, %v972_v54  ;;  %v988_v60 = vmul.f32 %v984_v57, %v958_v53 }
 0x549   : > { %v959_v61 = vpop.f32.mrf.mxu0  ;;  %v973_v62 = vpop.f32.mrf.mxu1 }
 0x54a   : > { %v960_v63 = vadd.f32 %v959_v61, %v864_v49  ;;  %v974_v0 = vadd.f32 %v973_v62, %v865_v50  ;;  %v992_v2 = vadd.f32 %v988_v60, %v958_v53  ;;  %v993_v3 = vadd.f32 %v989_v59, %v972_v54 }
 0x54c   : > { %v982_v4 = vmul.f32 0.044715, %v960_v63  ;;  %v983_v5 = vmul.f32 0.044715, %v974_v0  ;;  %v996_v9 = vmul.f32 0.7978846, %v992_v2 }
 0x54d   : > { %v997_v47 = vmul.f32 0.7978846, %v993_v3  ;;  %v978_v25 = vmul.f32 0.5, %v960_v63  ;;  %v979_v28 = vmul.f32 0.5, %v974_v0 }
 0x54e   : > { %v986_v6 = vmul.f32 %v982_v4, %v960_v63  ;;  %v987_v8 = vmul.f32 %v983_v5, %v974_v0  ;;  %1875 = vtanh.f32 %v996_v9 }
 0x54f   : > { %1877 = vtanh.f32 %v997_v47 }
 0x550   : > { %v991_v48 = vmul.f32 %v987_v8, %v974_v0  ;;  %v990_v11 = vmul.f32 %v986_v6, %v960_v63 }
 0x552   : > { %v995_v13 = vadd.f32 %v991_v48, %v974_v0  ;;  %v994_v14 = vadd.f32 %v990_v11, %v960_v63 }
 0x554   : > { %v999_v15 = vmul.f32 0.7978846, %v995_v13  ;;  %v998_v16 = vmul.f32 0.7978846, %v994_v14  ;;  %v1876_v17 = vpop.eup %1875 }
 0x555   : > { %v1878_v18 = vpop.eup %1877  ;;  %v1004_v20 = vadd.f32 1.0, %v1876_v17  ;;  %v1216_v17 = vperm.slane %v2455_v19, 3 }
 0x556   : > { %1879 = vtanh.f32 %v998_v16  ;;  %v1005_v22 = vadd.f32 1.0, %v1878_v18 }
 0x557   : > { %1881 = vtanh.f32 %v999_v15  ;;  %v1008_v10 = vmul.f32 %v1004_v20, %v976_v24 }
 0x558   : > { %v1009_v33 = vmul.f32 %v1005_v22, %v977_v27 }
 0x55c   : > { %v1880_v21 = vpop.eup %1879 }
 0x55d   : > { %v1882_v23 = vpop.eup %1881  ;;  %v1006_v26 = vadd.f32 1.0, %v1880_v21 }
 0x55e   : > { %v1007_v31 = vadd.f32 1.0, %v1882_v23 }
 0x55f   : > { %v1010_v32 = vmul.f32 %v1006_v26, %v978_v25 }
 0x560   : > { %v1011_v34 = vmul.f32 %v1007_v31, %v979_v28 }
 0x561   : > { %v1012_v12 = vpack.c.bf16 %v1010_v32, %v1008_v10 }
 0x562   : > { %v1013_v35 = vpack.c.bf16 %v1011_v34, %v1009_v33 }
 0x563   : > { %1151 = vmatmul.bf16.vlgmr.msrb.gmra.mxu2 %v1012_v12 }
 0x564   : > { %1165 = vmatmul.bf16.vlgmr.msra.gmra.mxu3 %v1013_v35 }
 0x5e6   : > { %v1152_v37 = vpop.f32.mrf.mxu2 }
 0x5e7   : > { %v1153_v38 = vadd.f32 %v1152_v37, %v1046_v36  ;;  %v1166_v39 = vpop.f32.mrf.mxu3 }
 0x5e9   : > { %v1167_v40 = vadd.f32 %v1166_v39, %v1153_v38 }
 0x5eb   : > { %v1171_v41 = vadd.f32 %v1167_v40, %v2461_v29  ;;  %v1243_v29 = vsel %vm1242_vm8, %v2431_v1, 0.0 }
 0x5ed   : > { %1173 = vadd.xlane.f32.xlu0 %v1171_v41 }
 0x5ee   : > { %v1154_v42 = vpop.f32.mrf.mxu2 }
 0x5ef   : > { %v1155_v43 = vadd.f32 %v1154_v42, %v1046_v36  ;;  %v1168_v44 = vpop.f32.mrf.mxu3 }
 0x5f1   : > { %v1169_v45 = vadd.f32 %v1168_v44, %v1155_v43 }
 0x5f3   : > { %v1172_v46 = vadd.f32 %v1169_v45, %v2463_v30 }
 0x5f5   : > { %1175 = vadd.xlane.f32.xlu2 %v1172_v46  ;;  %1244 = vadd.xlane.f32.xlu0 %v1243_v29 }
 0x660   : > { %v1174_v49 = vpop.xlane.xlu0 %1173 }
 0x661   : > { %v1177_v50 = vmul.f32 %v1174_v49, %v2441_v7 }
 0x663   : > { %v1179_v51 = vsub.f32 %v1171_v41, %v1177_v50 }
 0x665   : > { %v1181_v52 = vmul.f32 %v1179_v51, %v1179_v51 }
 0x667   : > { %1183 = vadd.xlane.f32.xlu2 %v1181_v52 }
 0x668   : > { %v1176_v53 = vpop.xlane.xlu2 %1175  ;;  %v1245_v22 = vpop.xlane.xlu0 %1244 }
 0x669   : > { %v1178_v54 = vmul.f32 %v1176_v53, %v2441_v7  ;;  %v1246_v23 = vmax.f32 %v1245_v22, 1e-09 }
 0x66b   : > { %v1180_v55 = vsub.f32 %v1172_v46, %v1178_v54  ;;  %vm1252_vm15 = vweird.f32 %v1246_v23  ;;  %v1256_v31 = vand.u32 2147483647, %v1246_v23 }
 0x66d   : > { %v1182_v56 = vmul.f32 %v1180_v55, %v1180_v55 }
 0x66f   : > { %1185 = vadd.xlane.f32.xlu1 %v1182_v56 }
 0x6da   : > { %v1184_v57 = vpop.xlane.xlu2 %1183 }
 0x6db   : > { %v1187_v30 = vmul.f32 %v1184_v57, %v2441_v7 }
 0x6dd   : > { %v1189_v58 = vadd.f32 1e-12, %v1187_v30 }
 0x6df   : > { %1883 = vrsqrt.f32 %v1189_v58  ;;  %vm1197_vm10 = vweird.f32 %v1189_v58 }
 0x6e2   : > { %v1186_v59 = vpop.xlane.xlu1 %1185 }
 0x6e3   : > { %v1188_v60 = vmul.f32 %v1186_v59, %v2441_v7  ;;  %v1213_v7 = vperm.slane %v2455_v19, 2  ;;  %v1258_v19 = vand.u32 2147483648, %v1246_v23 }
 0x6e5   : > { %v1884_v61 = vpop.eup %1883  ;;  %v1190_v62 = vadd.f32 1e-12, %v1188_v60 }
 0x6e6   : > { %v1192_v63 = vmul.f32 %v1884_v61, %v1189_v58  ;;  %vm1198_vm9 = vweird.f32 %v1884_v61 }
 0x6e7   : > { %1885 = vrsqrt.f32 %v1190_v62  ;;  %vm1199_vm11 = vmor %vm1197_vm10, %vm1198_vm9  ;;  %vm1207_vm13 = vweird.f32 %v1190_v62 }
 0x6e8   : > { %v1193_v0 = vmul.f32 %v1884_v61, %v1192_v63  ;;  %1887 = vrcp.f32 %v1246_v23 }
 0x6ea   : > { %v1194_v2 = vmul.f32 0.5, %v1193_v0 }
 0x6ec   : > { %v1195_v3 = vsub.f32 1.5, %v1194_v2 }
 0x6ed   : > { %v1886_v4 = vpop.eup %1885 }
 0x6ee   : > { %v1202_v5 = vmul.f32 %v1886_v4, %v1190_v62  ;;  %v1196_v6 = vmul.f32 %v1884_v61, %v1195_v3  ;;  %vm1208_vm12 = vweird.f32 %v1886_v4  ;;  %v1888_v24 = vpop.eup %1887 }
 0x6ef   : > { %vm1209_vm14 = vmor %vm1207_vm13, %vm1208_vm12  ;;  %v1248_v25 = vmul.f32 %v1888_v24, %v1246_v23  ;;  %vm1253_vm1 = vweird.f32 %v1888_v24 }
 0x6f0   : > { %v1203_v8 = vmul.f32 %v1886_v4, %v1202_v5  ;;  %v1200_v47 = vsel %vm1199_vm11, %v1884_v61, %v1196_v6  ;;  %vm1254_vm2 = vmor %vm1252_vm15, %vm1253_vm1 }
 0x6f1   : > { %v1211_v13 = vmul.f32 %v1200_v47, %v1179_v51  ;;  %v1249_v26 = vsub.f32 1.0, %v1248_v25 }
 0x6f2   : > { %v1204_v9 = vmul.f32 0.5, %v1203_v8 }
 0x6f3   : > { %v1214_v18 = vmul.f32 %v1213_v7, %v1211_v13  ;;  %v1250_v27 = vmul.f32 %v1888_v24, %v1249_v26 }
 0x6f4   : > { %v1205_v48 = vsub.f32 1.5, %v1204_v9 }
 0x6f5   : > { %v1217_v21 = vadd.f32 %v1216_v17, %v1214_v18  ;;  %v1251_v28 = vadd.f32 %v1888_v24, %v1250_v27 }
 0x6f6   : > { %v1206_v11 = vmul.f32 %v1886_v4, %v1205_v48 }
 0x6f7   : > { %v1255_v10 = vsel %vm1254_vm2, %v1888_v24, %v1251_v28 }
 0x6f8   : > { %v1210_v14 = vsel %vm1209_vm14, %v1886_v4, %v1206_v11 }
 0x6f9   : > { %v1212_v15 = vmul.f32 %v1210_v14, %v1180_v55 }
 0x6fb   : > { %v1215_v16 = vmul.f32 %v1213_v7, %v1212_v15 }
 0x6fd   : > { %v1218_v20 = vadd.f32 %v1216_v17, %v1215_v16 }
 0x6ff   : > { %1236 = vmatpush.msra.mxu0 %v1218_v20 }
 0x701   : > { %1237 = vmatpush.msra.mxu0 %v1217_v21 }
 0x702   : > { %1684 = vmatmul.msk.f32.vlgmr.msra.gmra.mxu0 %vm668_vm0, %v2431_v1  ;;  %v1259_v1 = vor.u32 1.1754944e-38, %v1258_v19  ;;  %vm1257_vm0 = vcmp.eq.f32.partialorder %v1256_v31, 8.507059e+37 }
 0x704   : > { %v1260_v33 = vsel %vm1257_vm0, %v1259_v1, %v1255_v10 }
 0x77f   : > { %v1239_v32 = vpop.f32.mrf.mxu0 }
 0x780   : > { %v1261_v34 = vmul.f32 %v1260_v33, %v1239_v32 }
 0x782   : > { %1262 = vst [vmem:[%s439_s4] sm:$0x1] %v1261_v34 }
 0x783   : > { %2126 = shalt.err (!%p2123_p5)
}
 0x784   : > { %1776 = dma.vmem_to_hbm [thread:$0]  (%p2333_p0), %s1275_s21, 16, %s1277_s11, %s1264_s9  }
 0x785 PF: > { %s1288_s2 = sand.u32 1, %s2169_s27   ;;  %p2551_p10 = scmp.ge.s32.totalorder %s2181_s30, 2 }
 0x786   : > { %s1289_s29 = scalar_lea.sflag [#allocation4], %s1288_s2 }
 0x787   : > { %p1802_p11 = pnand %p2551_p10, %p2341_p6 }
 0x789   : > { %p1803_p12 = pneg %p1802_p11 }
 0x78b   : > { %2164 = dma.done.wait (%p1803_p12), %s1289_s29, 16  }
 0x78c   : > { %2166 = vsyncadd (%p1803_p12), %s1289_s29, 4294967280  ;;  %s2552_s0 = sld [smem:[#allocation21_spill]]  ;;  %p26_p2 = scmp.ge.s32.totalorder %s2309_s14, 4  }
 0x78d   : > { %s2553_s29 = sld [smem:[#allocation22_spill]]  ;;  %s2554_s27 = smov %s2173_s28 }
 0x78e   : > { %s2556_s30 = smov %s2309_s14  ;;  %28 = sbr.rel (!%p26_p2) target bundleno = 16 (0x10), region = 130 }
 0x792   : > { %s2555_s28 = smov %s2552_s0 }
 0x793   :  { %1294 = vsyncpa [#allocation3], 1 }
 0x794   :  { %1296 = vsyncpa [#allocation3 + $0x1], 1 }
 0x795   :  { %1297 = vsyncpa [#allocation6], 1 }
 0x796   :  { %1299 = vsyncpa [#allocation6 + $0x1], 1 }
 0x797   :  { %1300 = vsyncpa [#allocation9], 1 }
 0x798   :  { %1301 = vsyncpa [#allocation12], 1 }
 0x799   :  { %1302 = vsyncpa [#allocation4], 1 }
 0x79a   :  { %1304 = vsyncpa [#allocation4 + $0x1], 1 }

</bundles_post_ra>
